<compile_context>
chip_gen: v6e
topology: v6e:2x2x1
jax: 0.10.0
libtpu: 0.0.40
codegen_flags: <defaults>
</compile_context>

<pallas_src>
import math

import jax
import jax.numpy as jnp
from jax.experimental import pallas as pl
from jax.experimental.pallas import tpu as pltpu

_INV_SQRT2 = 1.0 / math.sqrt(2.0)


def _round_up(a, b):
    return ((a + b - 1) // b) * b


def _gelu_exact(h):
    # Exact (erf-form) GELU, matching PyTorch nn.GELU() default. Computed in f32.
    return 0.5 * h * (1.0 + jax.lax.erf(h * _INV_SQRT2))


# ---------------------------------------------------------------------------
# Kernels
# ---------------------------------------------------------------------------
def _mlp_kernel_resident(x_ref, w1_ref, b1_ref, w2_ref, b2_ref, o_ref):
    """Grid = (row blocks,). Full fc1/fc2 weights are VMEM-resident (constant
    index maps), so each row tile is computed in one shot: no accumulator."""
    h = jnp.dot(x_ref[...], w1_ref[...], preferred_element_type=jnp.float32)
    h = _gelu_exact(h + b1_ref[...].astype(jnp.float32))
    # drop1 / drop2: p = 0.0 -> identity.
    # TODO(synk): non-zero dropout would need pltpu.prng_seed/prng_random_bits masking.
    out = jnp.dot(h.astype(w2_ref.dtype), w2_ref[...],
                  preferred_element_type=jnp.float32)
    o_ref[...] = (out + b2_ref[...].astype(jnp.float32)).astype(o_ref.dtype)


def _mlp_kernel_tiled(x_ref, w1_ref, b1_ref, w2_ref, b2_ref, o_ref, acc_ref):
    """Grid = (row blocks i [parallel], hidden blocks k [arbitrary reduction]).
    Used only when the full weights do not fit in VMEM; wrapper guarantees
    at least 2 k steps."""
    k = pl.program_id(1)
    nk = pl.num_programs(1)

    h = jnp.dot(x_ref[...], w1_ref[...], preferred_element_type=jnp.float32)
    h = _gelu_exact(h + b1_ref[...].astype(jnp.float32))
    # drop1 / drop2: p = 0.0 -> identity.
    partial = jnp.dot(h.astype(w2_ref.dtype), w2_ref[...],
                      preferred_element_type=jnp.float32)

    @pl.when(k == 0)
    def _():
        acc_ref[...] = partial

    @pl.when(jnp.logical_and(k > 0, k < nk - 1))
    def _():
        acc_ref[...] += partial

    # Fused finalize: fold the last partial product and the fc2 bias directly
    # into the store instead of a separate accumulator read-modify-write pass.
    @pl.when(k == nk - 1)
    def _():
        o_ref[...] = (acc_ref[...] + partial
                      + b2_ref[...].astype(jnp.float32)).astype(o_ref.dtype)


# ---------------------------------------------------------------------------
# Tile selection helpers
# ---------------------------------------------------------------------------
def _vmem_capacity_bytes():
    try:
        info = pltpu.get_tpu_info()
        cap = int(getattr(info, "vmem_capacity_bytes", 0))
        if cap > 0:
            return cap
    except Exception:
        pass
    return 64 << 20  # conservative default (v7x per-TC); v5e/v6e have 128 MiB


def _row_plan(M, tm_max):
    """Split M rows into equal blocks of at most tm_max rows (each a multiple
    of 8), bounding padding waste to < 8 rows per block."""
    tm_max = max(8, _round_up(tm_max, 8))
    if M <= tm_max:
        n_blocks = 1
        tm = _round_up(M, 8)
    else:
        n_blocks = -(-M // tm_max)
        tm = _round_up(-(-M // n_blocks), 8)
    # v7x megacore: give both TensorCores a row block for larger M.
    if n_blocks == 1 and M >= 512:
        n_blocks = 2
        tm = _round_up(-(-M // 2), 8)
    return tm, n_blocks, tm * n_blocks


def _vmem_bytes(tm, C, th, x_sz, w_sz, *, with_acc):
    """Conservative VMEM footprint for one grid step (double-buffered tiles,
    padded to the (8,128) layout, including the fc1 intermediate)."""
    p128 = lambda n: _round_up(n, 128)
    p8 = lambda n: _round_up(max(n, 1), 8)
    b = (2 * tm * p128(C) * x_sz            # x tile (double-buffered)
         + 2 * tm * p128(C) * x_sz          # out tile
         + 2 * p8(C) * p128(th) * w_sz      # fc1 weight block
         + 2 * p8(th) * p128(C) * w_sz      # fc2 weight block
         + 2 * 8 * p128(th) * 4             # fc1 bias block (f32)
         + 2 * 8 * p128(C) * 4              # fc2 bias (f32)
         + tm * p128(th) * 4                # f32 fc1 intermediate (GELU in/out)
         + tm * p128(th) * w_sz             # cast copy of h fed to fc2
         + tm * p128(C) * 4)                # f32 fc2 result before cast/store
    if with_acc:
        b += tm * p128(C) * 4               # accumulator scratch
    return b


# ---------------------------------------------------------------------------
# Wrapper
# ---------------------------------------------------------------------------
def mlp_pallas(x, w1, b1, w2, b2, *, compute_dtype=None,
               row_tile=None, hidden_tile=None):
    """Forward pass of the ViT / MLP-Mixer `Mlp` module (drop=0.0).

    x: (B, N, C); w1: (C, H); b1: (H,); w2: (H, C); b2: (C,).
    compute_dtype: optional cast for x/w1/w2 fed to the MXU (e.g. jnp.bfloat16);
        accumulation stays f32 and the output keeps x's original dtype.
    row_tile / hidden_tile: optional caps on the automatically chosen tiles
        (hidden_tile < H forces the H-reduction path).
    """
    B, N, C = x.shape
    Cw, H = w1.shape
    assert Cw == C and w2.shape == (H, C) and b1.shape == (H,) and b2.shape == (C,)
    M = B * N

    out_dtype = x.dtype
    if compute_dtype is not None:
        x = x.astype(compute_dtype)
        w1 = w1.astype(compute_dtype)
        w2 = w2.astype(compute_dtype)

    x_sz = jnp.dtype(x.dtype).itemsize
    w_sz = jnp.dtype(w1.dtype).itemsize
    b_sz = jnp.dtype(b1.dtype).itemsize

    cap = _vmem_capacity_bytes()
    budget = int(0.85 * cap)

    tm_candidates = [1024, 768, 512, 384, 256, 192, 128, 64, 32, 16, 8]
    if row_tile is not None:
        rt = max(8, int(row_tile))
        tm_candidates = [t for t in tm_candidates if t <= rt] or [rt]

    force_tiled = hidden_tile is not None and hidden_tile < H

    chosen = None
    # --- path 1: full-H VMEM-resident weights (weights DMA'd once) ----------
    if not force_tiled:
        for tm_max in tm_candidates:
            tm, nb, M_pad = _row_plan(M, tm_max)
            if _vmem_bytes(tm, C, H, x_sz, w_sz, with_acc=False) <= budget:
                chosen = ("resident", tm, nb, M_pad, H, 1)
                break

    # --- path 2: tile H (reduction axis) with an f32 accumulator ------------
    if chosen is None:
        th_all = [1024, 768, 512, 384, 256, 128]
        th_max = int(hidden_tile) if hidden_tile is not None else th_all[0]
        th_candidates = [t for t in th_all if t <= max(128, th_max)] or [128]
        for tm_max in tm_candidates:
            tm, nb, M_pad = _row_plan(M, tm_max)
            for th in th_candidates:
                if th >= H:  # single k step would just be the resident path
                    continue
                if _vmem_bytes(tm, C, th, x_sz, w_sz, with_acc=True) <= budget:
                    H_pad = _round_up(H, th)
                    chosen = ("tiled", tm, nb, M_pad, th, H_pad // th)
                    break
            if chosen is not None:
                break

    # --- last-resort fallback ------------------------------------------------
    if chosen is None:
        tm, nb, M_pad = _row_plan(M, 128)
        if H <= 128:
            chosen = ("resident", tm, nb, M_pad, H, 1)
        else:
            H_pad = _round_up(H, 128)
            chosen = ("tiled", tm, nb, M_pad, 128, H_pad // 128)

    mode, tm, nb, M_pad, th, nk = chosen

    # ---- pad operands --------------------------------------------------------
    x2 = x.reshape(M, C)
    if M_pad != M:
        x2 = jnp.pad(x2, ((0, M_pad - M), (0, 0)))
    b1_2 = b1.reshape(1, H)
    b2_2 = b2.reshape(1, C)

    if mode == "tiled":
        H_pad = th * nk
        if H_pad != H:
            # Zero-padding the hidden dim is exact: GELU(0) = 0 contributes nothing.
            w1 = jnp.pad(w1, ((0, 0), (0, H_pad - H)))
            w2 = jnp.pad(w2, ((0, H_pad - H), (0, 0)))
            b1_2 = jnp.pad(b1_2, ((0, 0), (0, H_pad - H)))
    else:
        H_pad = H

    # ---- cost / VMEM budgeting ------------------------------------------------
    weight_passes = 1 if mode == "resident" else nb   # resident: weights read once
    cost = pl.CostEstimate(
        flops=4 * M_pad * C * H_pad,
        transcendentals=M_pad * H_pad,
        bytes_accessed=(2 * M_pad * C * x_sz
                        + weight_passes * 2 * C * H_pad * w_sz
                        + weight_passes * (H_pad + C) * b_sz),
    )
    est = _vmem_bytes(tm, C, th, x_sz, w_sz, with_acc=(mode == "tiled"))
    vmem_limit = max(32 << 20, int(est * 1.2) + (4 << 20))
    vmem_limit = min(vmem_limit, int(0.9 * cap))

    # ---- pallas_call ------------------------------------------------------------
    if mode == "resident":
        grid = (nb,)
        in_specs = [
            pl.BlockSpec((tm, C), lambda i: (i, 0)),      # x rows (streamed)
            pl.BlockSpec((C, H_pad), lambda i: (0, 0)),   # fc1 weight (resident)
            pl.BlockSpec((1, H_pad), lambda i: (0, 0)),   # fc1 bias (resident)
            pl.BlockSpec((H_pad, C), lambda i: (0, 0)),   # fc2 weight (resident)
            pl.BlockSpec((1, C), lambda i: (0, 0)),       # fc2 bias (resident)
        ]
        out_specs = pl.BlockSpec((tm, C), lambda i: (i, 0))
        scratch_shapes = []
        kernel = _mlp_kernel_resident
        dim_sem = ("parallel",)
    else:
        grid = (nb, nk)
        in_specs = [
            pl.BlockSpec((tm, C), lambda i, k: (i, 0)),   # x rows
            pl.BlockSpec((C, th), lambda i, k: (0, k)),   # fc1 weight block
            pl.BlockSpec((1, th), lambda i, k: (0, k)),   # fc1 bias block
            pl.BlockSpec((th, C), lambda i, k: (k, 0)),   # fc2 weight block
            pl.BlockSpec((1, C), lambda i, k: (0, 0)),    # fc2 bias
        ]
        out_specs = pl.BlockSpec((tm, C), lambda i, k: (i, 0))
        scratch_shapes = [pltpu.VMEM((tm, C), jnp.float32)]
        kernel = _mlp_kernel_tiled
        dim_sem = ("parallel", "arbitrary")

    out = pl.pallas_call(
        kernel,
        out_shape=jax.ShapeDtypeStruct((M_pad, C), out_dtype),
        grid_spec=pltpu.PrefetchScalarGridSpec(
            num_scalar_prefetch=0,
            grid=grid,
            in_specs=in_specs,
            out_specs=out_specs,
            scratch_shapes=scratch_shapes,
        ),
        compiler_params=pltpu.CompilerParams(
            dimension_semantics=dim_sem,
            vmem_limit_bytes=vmem_limit,
        ),
        cost_estimate=cost,
    )(x2, w1, b1_2, w2, b2_2)

    return out[:M].reshape(B, N, C)


# ---------------------------------------------------------------------------
# Reference + demo
# ---------------------------------------------------------------------------
def _mlp_ref(x, w1, b1, w2, b2):
    h = x @ w1 + b1
    h = 0.5 * h * (1.0 + jax.lax.erf(h * _INV_SQRT2))
    return h @ w2 + b2


def _torch_linear_init(key, fan_in, fan_out):
    """Deterministic init matching nn.Linear defaults (returns (in, out) weight)."""
    kw, kb = jax.random.split(key)
    bound = 1.0 / math.sqrt(fan_in)
    w_t = jax.random.uniform(kw, (fan_in, fan_out), jnp.float32, -bound, bound)
    b = jax.random.uniform(kb, (fan_out,), jnp.float32, -bound, bound)
    return w_t, b


if __name__ == "__main__":
    key = jax.random.PRNGKey(0)
    keys = jax.random.split(key, 9)

    # --- test 1: small MLP-Mixer-like shapes, resident-weight path ----------
    B, N, C, H = 2, 8, 16, 32
    x = jax.random.normal(keys[0], (B, N, C), jnp.float32)
    w1, b1 = _torch_linear_init(keys[1], C, H)
    w2, b2 = _torch_linear_init(keys[2], H, C)
    y = mlp_pallas(x, w1, b1, w2, b2)
    jax.block_until_ready(y)
    y_ref = _mlp_ref(x, w1, b1, w2, b2)
    assert jnp.allclose(y, y_ref, atol=1e-5, rtol=1e-5), "mismatch (test 1)"

    # --- test 2: ragged M + forced hidden-reduction (tiled kernel) + padding -
    B2, N2, C2, H2 = 3, 5, 24, 256
    x_b = jax.random.normal(keys[3], (B2, N2, C2), jnp.float32)
    w1_b, b1_b = _torch_linear_init(keys[4], C2, H2)
    w2_b, b2_b = _torch_linear_init(keys[5], H2, C2)
    y_b = mlp_pallas(x_b, w1_b, b1_b, w2_b, b2_b, hidden_tile=128)
    jax.block_until_ready(y_b)
    y_b_ref = _mlp_ref(x_b, w1_b, b1_b, w2_b, b2_b)
    assert jnp.allclose(y_b, y_b_ref, atol=1e-4, rtol=1e-4), "mismatch (test 2)"

    # --- test 3: bf16 MXU operands (mixed precision), resident path ---------
    B3, N3, C3, H3 = 2, 64, 128, 384
    x_c = jax.random.normal(keys[6], (B3, N3, C3), jnp.float32)
    w1_c, b1_c = _torch_linear_init(keys[7], C3, H3)
    w2_c, b2_c = _torch_linear_init(keys[8], H3, C3)
    y_c = mlp_pallas(x_c, w1_c, b1_c, w2_c, b2_c, compute_dtype=jnp.bfloat16)
    jax.block_until_ready(y_c)
    y_c_ref = _mlp_ref(x_c, w1_c, b1_c, w2_c, b2_c)
    err = float(jnp.max(jnp.abs(y_c - y_c_ref)))
    assert err < 5e-2, f"mismatch (test 3): max abs err {err}"

    print("KERNEL_OK")
</pallas_src>

<mosaic_0001>
module attributes {stable_mosaic.version = 11 : i64} {
  func.func @_mlp_kernel_resident(%arg0: i32, %arg1: memref<16x16xf32, #tpu.memory_space<vmem>>, %arg2: memref<16x32xf32, #tpu.memory_space<vmem>>, %arg3: memref<1x32xf32, #tpu.memory_space<vmem>>, %arg4: memref<32x16xf32, #tpu.memory_space<vmem>>, %arg5: memref<1x16xf32, #tpu.memory_space<vmem>>, %arg6: memref<16x16xf32, #tpu.memory_space<vmem>>) attributes {dimension_semantics = [#tpu.dimension_semantics<parallel>], iteration_bounds = array<i64: 1>, scalar_prefetch = 0 : i64, scratch_operands = 0 : i64, tpu.core_type = #tpu.core_type<tc>, window_params = [{transform_indices = @transform_0, window_bounds = array<i64: 16, 16>}, {pipeline_mode = #tpu.pipeline_mode<synchronous>, transform_indices = @transform_1, window_bounds = array<i64: 16, 32>}, {pipeline_mode = #tpu.pipeline_mode<synchronous>, transform_indices = @transform_2, window_bounds = array<i64: 1, 32>}, {pipeline_mode = #tpu.pipeline_mode<synchronous>, transform_indices = @transform_3, window_bounds = array<i64: 32, 16>}, {pipeline_mode = #tpu.pipeline_mode<synchronous>, transform_indices = @transform_4, window_bounds = array<i64: 1, 16>}, {transform_indices = @transform_5, window_bounds = array<i64: 16, 16>}]} {
    %c0 = arith.constant 0 : index
    %c0_0 = arith.constant 0 : index
    %0 = vector.load %arg1[%c0, %c0_0] : memref<16x16xf32, #tpu.memory_space<vmem>>, vector<16x16xf32>
    %c0_1 = arith.constant 0 : index
    %c0_2 = arith.constant 0 : index
    %1 = vector.load %arg2[%c0_1, %c0_2] : memref<16x32xf32, #tpu.memory_space<vmem>>, vector<16x32xf32>
    %cst = arith.constant dense<0.000000e+00> : vector<16x32xf32>
    %2 = tpu.matmul %0, %1, %cst {dimension_numbers = #tpu.dot_dimension_numbers<[1], [0], [0], [1], [0, 0, 1, 1], [], []>} : vector<16x16xf32>, vector<16x32xf32>, vector<16x32xf32> -> vector<16x32xf32>
    %c0_3 = arith.constant 0 : index
    %c0_4 = arith.constant 0 : index
    %3 = vector.load %arg3[%c0_3, %c0_4] : memref<1x32xf32, #tpu.memory_space<vmem>>, vector<1x32xf32>
    %4 = vector.broadcast %3 : vector<1x32xf32> to vector<16x32xf32>
    %5 = arith.addf %2, %4 : vector<16x32xf32>
    %cst_5 = arith.constant 5.000000e-01 : f32
    %6 = vector.broadcast %cst_5 : f32 to vector<16x32xf32>
    %7 = arith.mulf %6, %5 : vector<16x32xf32>
    %cst_6 = arith.constant 0.707106769 : f32
    %8 = vector.broadcast %cst_6 : f32 to vector<16x32xf32>
    %9 = arith.mulf %5, %8 : vector<16x32xf32>
    %10 = math.erf %9 : vector<16x32xf32>
    %cst_7 = arith.constant 1.000000e+00 : f32
    %11 = vector.broadcast %cst_7 : f32 to vector<16x32xf32>
    %12 = arith.addf %11, %10 : vector<16x32xf32>
    %13 = arith.mulf %7, %12 : vector<16x32xf32>
    %c0_8 = arith.constant 0 : index
    %c0_9 = arith.constant 0 : index
    %14 = vector.load %arg4[%c0_8, %c0_9] : memref<32x16xf32, #tpu.memory_space<vmem>>, vector<32x16xf32>
    %cst_10 = arith.constant dense<0.000000e+00> : vector<16x16xf32>
    %15 = tpu.matmul %13, %14, %cst_10 {dimension_numbers = #tpu.dot_dimension_numbers<[1], [0], [0], [1], [0, 0, 1, 1], [], []>} : vector<16x32xf32>, vector<32x16xf32>, vector<16x16xf32> -> vector<16x16xf32>
    %c0_11 = arith.constant 0 : index
    %c0_12 = arith.constant 0 : index
    %16 = vector.load %arg5[%c0_11, %c0_12] : memref<1x16xf32, #tpu.memory_space<vmem>>, vector<1x16xf32>
    %17 = vector.broadcast %16 : vector<1x16xf32> to vector<16x16xf32>
    %18 = arith.addf %15, %17 : vector<16x16xf32>
    %c0_13 = arith.constant 0 : index
    %c0_14 = arith.constant 0 : index
    %19 = vector.load %arg6[%c0_13, %c0_14] : memref<16x16xf32, #tpu.memory_space<vmem>>, vector<16x16xf32>
    tpu.vector_store %arg6[%c0_13, %c0_14], %18 {strides = array<i32>} : memref<16x16xf32, #tpu.memory_space<vmem>>, vector<16x16xf32>,
    return
  }
  func.func @transform_0(%arg0: i32) -> (i32, i32) {
    %c0_i32 = arith.constant 0 : i32
    %c0_i32_0 = arith.constant 0 : i32
    return %arg0, %c0_i32 : i32, i32
  }
  func.func @transform_1(%arg0: i32) -> (i32, i32) {
    %c0_i32 = arith.constant 0 : i32
    %c0_i32_0 = arith.constant 0 : i32
    %c0_i32_1 = arith.constant 0 : i32
    return %c0_i32, %c0_i32_0 : i32, i32
  }
  func.func @transform_2(%arg0: i32) -> (i32, i32) {
    %c0_i32 = arith.constant 0 : i32
    %c0_i32_0 = arith.constant 0 : i32
    %c0_i32_1 = arith.constant 0 : i32
    return %c0_i32, %c0_i32_0 : i32, i32
  }
  func.func @transform_3(%arg0: i32) -> (i32, i32) {
    %c0_i32 = arith.constant 0 : i32
    %c0_i32_0 = arith.constant 0 : i32
    %c0_i32_1 = arith.constant 0 : i32
    return %c0_i32, %c0_i32_0 : i32, i32
  }
  func.func @transform_4(%arg0: i32) -> (i32, i32) {
    %c0_i32 = arith.constant 0 : i32
    %c0_i32_0 = arith.constant 0 : i32
    %c0_i32_1 = arith.constant 0 : i32
    return %c0_i32, %c0_i32_0 : i32, i32
  }
  func.func @transform_5(%arg0: i32) -> (i32, i32) {
    %c0_i32 = arith.constant 0 : i32
    %c0_i32_0 = arith.constant 0 : i32
    return %arg0, %c0_i32 : i32, i32
  }
}

</mosaic_0001>

<bundles_post_ra>
// kernel: tpu_custom_call.1
= control target key start
LH: loop header
LB: loop body
LE: loop exit
PB: predicated region body
PF: predicated region fallthrough
CT: control target
= control target key end

     0   :  { %vm32_vm0 = vcmask 130048   ;;  %s368_s0 = inlined_call_operand.vmem [shape: f32[16,16], index: 0, kind: input, shape index: {}]   ;;  %s369_s1 = inlined_call_operand.vmem [shape: f32[16,32], index: 1, kind: input, shape index: {}]   ;;  %s370_s2 = inlined_call_operand.vmem [shape: f32[1,32], index: 2, kind: input, shape index: {}]   ;;  %s371_s3 = inlined_call_operand.vmem [shape: f32[32,16], index: 3, kind: input, shape index: {}]   ;;  %s372_s4 = inlined_call_operand.vmem [shape: f32[1,16], index: 4, kind: input, shape index: {}]   ;;  %s373_s5 = inlined_call_operand.hbm [shape: f32[16,16], index: 5, kind: output, shape index: {}]  }
   0x1   :  { %v24_v0 = vld [vmem:[%s369_s1 + $0x8] sm:$0xff]  ;;  %v23_v1 = vld [vmem:[%s369_s1] sm:$0xff] }
   0x2   :  { %v21_v2 = vld [vmem:[%s368_s0] sm:$0xff]  ;;  %251 = vmatprep.subr.mxu0 %v24_v0 }
   0x3   :  { %255 = vmatprep.mubr.msk.f32.mxu0 %vm32_vm0, %v21_v2 }
   0x4   :  { %10 = vsyncpa [#allocation3], 0  ;;  %252 = vmatpush3.msra.mxu0 %v24_v0  ;;  %v22_v3 = vld [vmem:[%s368_s0 + $0x8] sm:$0xff]  ;;  %v127_v4 = vld [vmem:[%s371_s3 + $0x18] sm:$0xff]  ;;  %vm135_vm1 = vcmask 261120   ;;  %s298_s9 = smov [#allocation2]  }
   0x5   :  { %253 = vmatprep.subr.mxu0 %v23_v1  ;;  %258 = vmatprep.subr.mxu1 %v127_v4  ;;  %v126_v5 = vld [vmem:[%s371_s3 + $0x10] sm:$0xff]  ;;  %v125_v6 = vld [vmem:[%s371_s3 + $0x8] sm:$0xff]  ;;  %v124_v7 = vld [vmem:[%s371_s3] sm:$0xff]  ;;  %s224_s10 = sshll.u32 %s298_s9, 4  ;;  %s225_s10 = int_to_ptr.vmem [resolvable:$true] %s224_s10 }
   0x6   :  { %254 = vmatpush3.msra.mxu0 %v23_v1  ;;  %259 = vmatpush3.msra.mxu1 %v127_v4  ;;  %v235_v8 = vld [vmem:[%s370_s2] ss:$0 sm:$0xff]  ;;  %s276_s11 = scalar_lea.vmem %s225_s10, 256  ;;  %p281_p1 = scmp.lt.s32.totalorder %s225_s10, %s225_s10 }
   0x7   :  { %256 = vmatmul.mubr.msk.f32.vlgmr.msra.gmra.mxu0 %vm32_vm0, %v22_v3  ;;  %260 = vmatprep.subr.mxu1 %v126_v5  ;;  %v238_v23 = vld [vmem:[%s372_s4] ss:$0 sm:$0xff]  ;;  %p277_p0 = scmp.ne.s32.totalorder %s225_s10, %s276_s11  ;;  %p282_p2 = scmp.lt.s32.totalorder %s276_s11, %s276_s11 }
   0x8   :  { %261 = vmatpush3.msra.mxu1 %v126_v5 }
   0x9   :  { %262 = vmatprep.subr.mxu1 %v125_v6  ;;  %p283_p3 = por %p282_p2, %p281_p1 }
   0xa   :  { %263 = vmatpush3.msra.mxu1 %v125_v6 }
   0xb   :  { %264 = vmatprep.subr.mxu1 %v124_v7  ;;  %p284_p4 = pnand %p283_p3, %p277_p0 }
   0xc   :  { %265 = vmatpush3.msra.mxu1 %v124_v7 }
  0xc7   :  { %v257_v9 = vpop.f32.mrf.mxu0 }
  0xc8   :  { %v111_v10 = vadd.f32 %v257_v9, %v235_v8 }
  0xc9   :  { %v105_v11 = vpop.f32.mrf.mxu0 }
  0xca   :  { %v117_v12 = vmul.f32 0.70710677, %v111_v10  ;;  %v106_v13 = vadd.f32 %v235_v8, %v105_v11  ;;  %v115_v20 = vmul.f32 0.5, %v111_v10 }
  0xcc   :  { %272 = verf.f32 %v117_v12  ;;  %v116_v14 = vmul.f32 0.70710677, %v106_v13  ;;  %v114_v18 = vmul.f32 0.5, %v106_v13 }
  0xce   :  { %274 = verf.f32 %v116_v14 }
  0xd9   :  { %v273_v15 = vpop.eup %272 }
  0xda   :  { %v121_v17 = vadd.f32 1.0, %v273_v15 }
  0xdb   :  { %v275_v16 = vpop.eup %274 }
  0xdc   :  { %v120_v19 = vadd.f32 1.0, %v275_v16  ;;  %v123_v22 = vmul.f32 %v121_v17, %v115_v20 }
  0xde   :  { %v122_v21 = vmul.f32 %v120_v19, %v114_v18 }
  0xe0   :  { %266 = vmatprep.mubr.msk.f32.mxu1 %vm135_vm1, %v122_v21 }
  0xe1   :  { %267 = vmatmul.mubr.msk.f32.vlgmr.msra.gmra.mxu1 %vm135_vm1, %v123_v22 }
 0x1a1   :  { %v268_v24 = vpop.f32.mrf.mxu1 }
 0x1a2   :  { %v214_v25 = vadd.f32 %v268_v24, %v238_v23 }
 0x1a3   :  { %v208_v26 = vpop.f32.mrf.mxu1 }
 0x1a4   :  { %218 = vst.msk [vmem:[#allocation2 + $0x8] sm:$0xff] %vm32_vm0, %v214_v25  ;;  %v209_v27 = vadd.f32 %v238_v23, %v208_v26 }
 0x1a6   :  { %217 = vst.msk [vmem:[#allocation2] sm:$0xff] %vm32_vm0, %v209_v27 }
 0x1a7   :  { %287 = shalt.err (!%p284_p4)
}
 0x1a8   :  { %s299_s12 = smov 128   ;;  %s300_s4 = smov 8  }
 0x1a9   :  { %230 = dma.vmem_to_hbm [thread:$0]  %s225_s10, 256, %s373_s5, [#allocation3], %s299_s12, %s299_s12, %s300_s4  }
 0x1aa   :  { %296 = dma.done.wait [#allocation3], 256  }
 0x1ab   :  { %297 = vsyncadd [#allocation3], 4294967040 }
 0x1ac   :  { %234 = vsyncpa [#allocation3], 1 }

</bundles_post_ra>
